<compile_context>
chip_gen: v6e
topology: v6e:2x2x1
jax: 0.10.0
libtpu: 0.0.40
codegen_flags: <defaults>
</compile_context>

<pallas_src>
import jax
import jax.numpy as jnp
from jax.experimental import pallas as pl
from jax.experimental.pallas import tpu as pltpu


def _round_up(n, m):
    return (n + m - 1) // m * m


def _mlp_kernel(x_ref, w1_ref, w2_ref, w3_ref, w4_ref, bias_ref, o_ref):
    """Fused 4-layer MLP.  Matmuls run on the MXU in the weights' dtype
    (bf16 by default) with f32 accumulation; bias-add / ReLU stay in f32."""
    cdt = w1_ref.dtype
    n1 = w1_ref.shape[1]
    n2 = w2_ref.shape[1]
    n3 = w3_ref.shape[1]
    n4 = w4_ref.shape[1]

    x = x_ref[...]  # already cast to the compute dtype in the wrapper

    h = jnp.dot(x, w1_ref[...], preferred_element_type=jnp.float32)
    h = jnp.maximum(h + bias_ref[0:1, :n1], 0.0)

    h = jnp.dot(h.astype(cdt), w2_ref[...], preferred_element_type=jnp.float32)
    h = jnp.maximum(h + bias_ref[1:2, :n2], 0.0)

    h = jnp.dot(h.astype(cdt), w3_ref[...], preferred_element_type=jnp.float32)
    h = jnp.maximum(h + bias_ref[2:3, :n3], 0.0)

    out = jnp.dot(h.astype(cdt), w4_ref[...], preferred_element_type=jnp.float32)
    out = out + bias_ref[3:4, :n4]
    o_ref[...] = out.astype(o_ref.dtype)


def text_encoder_forward(x, params, *, block_b=256, weights_dtype=jnp.bfloat16):
    """Pallas implementation of TextEncoder.forward.

    x:      (B, input_features) float32
    params: dict with w1..w4 shaped (in, out) and b1..b4 shaped (out,)
    returns (B, output_features) float32
    """
    B, in_f = x.shape
    out_f = params["w4"].shape[1]
    LANE = 128

    # --- pad the narrow tail layers up to 128 lanes (zero cols / rows). -----
    n3, n4 = params["w3"].shape[1], params["w4"].shape[1]
    n3p, n4p = _round_up(n3, LANE), _round_up(n4, LANE)
    w1 = params["w1"].astype(weights_dtype)
    w2 = params["w2"].astype(weights_dtype)
    w3 = jnp.pad(params["w3"], ((0, 0), (0, n3p - n3))).astype(weights_dtype)
    w4 = jnp.pad(params["w4"], ((0, n3p - n3), (0, n4p - n4))).astype(weights_dtype)

    # --- pack the four f32 biases into one small VMEM buffer (4, bw). -------
    bw = max(w1.shape[1], w2.shape[1], n3p, n4p)

    def _row(b):
        b = b.reshape(-1)
        return jnp.pad(b, (0, bw - b.shape[0]))[None, :]

    bias = jnp.concatenate(
        [_row(params["b1"]), _row(params["b2"]),
         _row(params["b3"]), _row(params["b4"])], axis=0).astype(jnp.float32)

    # --- batch tiling: 8-aligned tile, pad B up to a multiple of it. --------
    block_b = _round_up(max(8, min(block_b, _round_up(B, 8))), 8)
    padded_b = _round_up(B, block_b)
    xc = x.astype(weights_dtype)
    if padded_b != B:
        xc = jnp.pad(xc, ((0, padded_b - B), (0, 0)))

    grid = (padded_b // block_b,)

    def _resident(shape):
        # Weights / biases: same full block every grid step (stay in VMEM).
        return pl.BlockSpec(shape, lambda i: (0, 0))

    in_specs = [
        pl.BlockSpec((block_b, in_f), lambda i: (i, 0)),   # x batch tile
        _resident(w1.shape), _resident(w2.shape),
        _resident(w3.shape), _resident(w4.shape),
        _resident(bias.shape),
    ]
    out_specs = pl.BlockSpec((block_b, n4p), lambda i: (i, 0))

    out_padded = pl.pallas_call(
        _mlp_kernel,
        out_shape=jax.ShapeDtypeStruct((padded_b, n4p), jnp.float32),
        grid_spec=pltpu.PrefetchScalarGridSpec(
            num_scalar_prefetch=0,
            grid=grid,
            in_specs=in_specs,
            out_specs=out_specs,
        ),
        compiler_params=pltpu.CompilerParams(
            dimension_semantics=("parallel",),
        ),
    )(xc, w1, w2, w3, w4, bias)

    return out_padded[:B, :out_f]


def init_params(key, input_features=768, output_features=37):
    """Deterministic synthetic init mimicking nn.Linear's uniform(+-1/sqrt(fan_in)).
    Weights stored as (in_features, out_features); biases as (out_features,)."""
    dims = [input_features, 384, 192, 48, output_features]
    params = {}
    for layer in range(4):
        fan_in, fan_out = dims[layer], dims[layer + 1]
        key, kw, kb = jax.random.split(key, 3)
        bound = 1.0 / (fan_in ** 0.5)
        params[f"w{layer + 1}"] = jax.random.uniform(
            kw, (fan_in, fan_out), jnp.float32, -bound, bound)
        params[f"b{layer + 1}"] = jax.random.uniform(
            kb, (fan_out,), jnp.float32, -bound, bound)
    return params


def reference_forward(x, params, weights_dtype=jnp.float32):
    """Pure-JAX reference mirroring the kernel's precision choices:
    matmul operands in weights_dtype, f32 accumulation, f32 bias/ReLU."""
    h = x
    for layer in range(1, 5):
        w = params[f"w{layer}"].astype(weights_dtype)
        b = params[f"b{layer}"]
        h = jnp.dot(h.astype(weights_dtype), w,
                    preferred_element_type=jnp.float32) + b
        if layer < 4:
            h = jnp.maximum(h, 0.0)
    return h


if __name__ == "__main__":
    key = jax.random.PRNGKey(0)
    kp, kx = jax.random.split(key)

    INPUT_FEATURES = 768
    OUTPUT_FEATURES = 37
    BATCH = 8  # small demo batch; wrapper pads/tiles any B

    params = init_params(kp, INPUT_FEATURES, OUTPUT_FEATURES)
    sentence_embedding = jax.random.normal(kx, (BATCH, INPUT_FEATURES), jnp.float32)

    out = text_encoder_forward(sentence_embedding, params)
    out = jax.block_until_ready(out)

    ref = reference_forward(sentence_embedding, params, weights_dtype=jnp.bfloat16)
    assert out.shape == (BATCH, OUTPUT_FEATURES), out.shape
    assert jnp.allclose(out, ref, atol=1e-2, rtol=1e-2), "mismatch vs reference"

    print("KERNEL_OK")
</pallas_src>

<mosaic_0001>
module attributes {stable_mosaic.version = 11 : i64} {
  func.func @_mlp_kernel(%arg0: i32, %arg1: memref<8x768xbf16, #tpu.memory_space<vmem>>, %arg2: memref<768x384xbf16, #tpu.memory_space<vmem>>, %arg3: memref<384x192xbf16, #tpu.memory_space<vmem>>, %arg4: memref<192x128xbf16, #tpu.memory_space<vmem>>, %arg5: memref<128x128xbf16, #tpu.memory_space<vmem>>, %arg6: memref<4x384xf32, #tpu.memory_space<vmem>>, %arg7: memref<8x128xf32, #tpu.memory_space<vmem>>) attributes {dimension_semantics = [#tpu.dimension_semantics<parallel>], iteration_bounds = array<i64: 1>, scalar_prefetch = 0 : i64, scratch_operands = 0 : i64, tpu.core_type = #tpu.core_type<tc>, window_params = [{transform_indices = @transform_0, window_bounds = array<i64: 8, 768>}, {pipeline_mode = #tpu.pipeline_mode<synchronous>, transform_indices = @transform_1, window_bounds = array<i64: 768, 384>}, {pipeline_mode = #tpu.pipeline_mode<synchronous>, transform_indices = @transform_2, window_bounds = array<i64: 384, 192>}, {pipeline_mode = #tpu.pipeline_mode<synchronous>, transform_indices = @transform_3, window_bounds = array<i64: 192, 128>}, {pipeline_mode = #tpu.pipeline_mode<synchronous>, transform_indices = @transform_4, window_bounds = array<i64: 128, 128>}, {pipeline_mode = #tpu.pipeline_mode<synchronous>, transform_indices = @transform_5, window_bounds = array<i64: 4, 384>}, {transform_indices = @transform_6, window_bounds = array<i64: 8, 128>}]} {
    %c0 = arith.constant 0 : index
    %c0_0 = arith.constant 0 : index
    %0 = vector.load %arg1[%c0, %c0_0] : memref<8x768xbf16, #tpu.memory_space<vmem>>, vector<8x768xbf16>
    %c0_1 = arith.constant 0 : index
    %c0_2 = arith.constant 0 : index
    %1 = vector.load %arg2[%c0_1, %c0_2] : memref<768x384xbf16, #tpu.memory_space<vmem>>, vector<768x384xbf16>
    %cst = arith.constant dense<0.000000e+00> : vector<8x384xf32>
    %2 = tpu.matmul %0, %1, %cst {dimension_numbers = #tpu.dot_dimension_numbers<[1], [0], [0], [1], [0, 0, 1, 1], [], []>} : vector<8x768xbf16>, vector<768x384xbf16>, vector<8x384xf32> -> vector<8x384xf32>
    %c0_3 = arith.constant 0 : index
    %c0_4 = arith.constant 0 : index
    %3 = vector.load %arg6[%c0_3, %c0_4] : memref<4x384xf32, #tpu.memory_space<vmem>>, vector<1x384xf32>
    %4 = vector.broadcast %3 : vector<1x384xf32> to vector<8x384xf32>
    %5 = arith.addf %2, %4 : vector<8x384xf32>
    %cst_5 = arith.constant 0.000000e+00 : f32
    %6 = vector.broadcast %cst_5 : f32 to vector<8x384xf32>
    %7 = arith.maximumf %5, %6 : vector<8x384xf32>
    %8 = arith.truncf %7 : vector<8x384xf32> to vector<8x384xbf16>
    %c0_6 = arith.constant 0 : index
    %c0_7 = arith.constant 0 : index
    %9 = vector.load %arg3[%c0_6, %c0_7] : memref<384x192xbf16, #tpu.memory_space<vmem>>, vector<384x192xbf16>
    %cst_8 = arith.constant dense<0.000000e+00> : vector<8x192xf32>
    %10 = tpu.matmul %8, %9, %cst_8 {dimension_numbers = #tpu.dot_dimension_numbers<[1], [0], [0], [1], [0, 0, 1, 1], [], []>} : vector<8x384xbf16>, vector<384x192xbf16>, vector<8x192xf32> -> vector<8x192xf32>
    %c1 = arith.constant 1 : index
    %c0_9 = arith.constant 0 : index
    %11 = vector.load %arg6[%c1, %c0_9] : memref<4x384xf32, #tpu.memory_space<vmem>>, vector<1x192xf32>
    %12 = vector.broadcast %11 : vector<1x192xf32> to vector<8x192xf32>
    %13 = arith.addf %10, %12 : vector<8x192xf32>
    %cst_10 = arith.constant 0.000000e+00 : f32
    %14 = vector.broadcast %cst_10 : f32 to vector<8x192xf32>
    %15 = arith.maximumf %13, %14 : vector<8x192xf32>
    %16 = arith.truncf %15 : vector<8x192xf32> to vector<8x192xbf16>
    %c0_11 = arith.constant 0 : index
    %c0_12 = arith.constant 0 : index
    %17 = vector.load %arg4[%c0_11, %c0_12] : memref<192x128xbf16, #tpu.memory_space<vmem>>, vector<192x128xbf16>
    %cst_13 = arith.constant dense<0.000000e+00> : vector<8x128xf32>
    %18 = tpu.matmul %16, %17, %cst_13 {dimension_numbers = #tpu.dot_dimension_numbers<[1], [0], [0], [1], [0, 0, 1, 1], [], []>} : vector<8x192xbf16>, vector<192x128xbf16>, vector<8x128xf32> -> vector<8x128xf32>
    %c2 = arith.constant 2 : index
    %c0_14 = arith.constant 0 : index
    %19 = vector.load %arg6[%c2, %c0_14] : memref<4x384xf32, #tpu.memory_space<vmem>>, vector<1x128xf32>
    %20 = vector.broadcast %19 : vector<1x128xf32> to vector<8x128xf32>
    %21 = arith.addf %18, %20 : vector<8x128xf32>
    %cst_15 = arith.constant 0.000000e+00 : f32
    %22 = vector.broadcast %cst_15 : f32 to vector<8x128xf32>
    %23 = arith.maximumf %21, %22 : vector<8x128xf32>
    %24 = arith.truncf %23 : vector<8x128xf32> to vector<8x128xbf16>
    %c0_16 = arith.constant 0 : index
    %c0_17 = arith.constant 0 : index
    %25 = vector.load %arg5[%c0_16, %c0_17] : memref<128x128xbf16, #tpu.memory_space<vmem>>, vector<128x128xbf16>
    %cst_18 = arith.constant dense<0.000000e+00> : vector<8x128xf32>
    %26 = tpu.matmul %24, %25, %cst_18 {dimension_numbers = #tpu.dot_dimension_numbers<[1], [0], [0], [1], [0, 0, 1, 1], [], []>} : vector<8x128xbf16>, vector<128x128xbf16>, vector<8x128xf32> -> vector<8x128xf32>
    %c3 = arith.constant 3 : index
    %c0_19 = arith.constant 0 : index
    %27 = vector.load %arg6[%c3, %c0_19] : memref<4x384xf32, #tpu.memory_space<vmem>>, vector<1x128xf32>
    %28 = vector.broadcast %27 : vector<1x128xf32> to vector<8x128xf32>
    %29 = arith.addf %26, %28 : vector<8x128xf32>
    %c0_20 = arith.constant 0 : index
    %c0_21 = arith.constant 0 : index
    %30 = vector.load %arg7[%c0_20, %c0_21] : memref<8x128xf32, #tpu.memory_space<vmem>>, vector<8x128xf32>
    tpu.vector_store %arg7[%c0_20, %c0_21], %29 {strides = array<i32>} : memref<8x128xf32, #tpu.memory_space<vmem>>, vector<8x128xf32>,
    return
  }
  func.func @transform_0(%arg0: i32) -> (i32, i32) {
    %c0_i32 = arith.constant 0 : i32
    %c0_i32_0 = arith.constant 0 : i32
    return %arg0, %c0_i32 : i32, i32
  }
  func.func @transform_1(%arg0: i32) -> (i32, i32) {
    %c0_i32 = arith.constant 0 : i32
    %c0_i32_0 = arith.constant 0 : i32
    %c0_i32_1 = arith.constant 0 : i32
    return %c0_i32, %c0_i32_0 : i32, i32
  }
  func.func @transform_2(%arg0: i32) -> (i32, i32) {
    %c0_i32 = arith.constant 0 : i32
    %c0_i32_0 = arith.constant 0 : i32
    %c0_i32_1 = arith.constant 0 : i32
    return %c0_i32, %c0_i32_0 : i32, i32
  }
  func.func @transform_3(%arg0: i32) -> (i32, i32) {
    %c0_i32 = arith.constant 0 : i32
    %c0_i32_0 = arith.constant 0 : i32
    %c0_i32_1 = arith.constant 0 : i32
    return %c0_i32, %c0_i32_0 : i32, i32
  }
  func.func @transform_4(%arg0: i32) -> (i32, i32) {
    %c0_i32 = arith.constant 0 : i32
    %c0_i32_0 = arith.constant 0 : i32
    %c0_i32_1 = arith.constant 0 : i32
    return %c0_i32, %c0_i32_0 : i32, i32
  }
  func.func @transform_5(%arg0: i32) -> (i32, i32) {
    %c0_i32 = arith.constant 0 : i32
    %c0_i32_0 = arith.constant 0 : i32
    %c0_i32_1 = arith.constant 0 : i32
    return %c0_i32, %c0_i32_0 : i32, i32
  }
  func.func @transform_6(%arg0: i32) -> (i32, i32) {
    %c0_i32 = arith.constant 0 : i32
    %c0_i32_0 = arith.constant 0 : i32
    return %arg0, %c0_i32 : i32, i32
  }
}

</mosaic_0001>

<bundles_post_ra>
// kernel: tpu_custom_call.1
= control target key start
LH: loop header
LB: loop body
LE: loop exit
PB: predicated region body
PF: predicated region fallthrough
CT: control target
= control target key end

     0   :  { %11 = vsyncpa [#allocation3], 0  ;;  %s2935_s0 = inlined_call_operand.vmem [shape: bf16[8,768], index: 0, kind: input, shape index: {}]   ;;  %s2936_s1 = inlined_call_operand.hbm [shape: bf16[768,384], index: 1, kind: input, shape index: {}]   ;;  %s2937_s2 = inlined_call_operand.vmem [shape: bf16[384,192], index: 2, kind: input, shape index: {}]   ;;  %s2938_s3 = inlined_call_operand.vmem [shape: bf16[192,128], index: 3, kind: input, shape index: {}]   ;;  %s2939_s4 = inlined_call_operand.vmem [shape: bf16[128,128], index: 4, kind: input, shape index: {}]   ;;  %s2940_s5 = inlined_call_operand.vmem [shape: f32[4,384], index: 5, kind: input, shape index: {}]   ;;  %s2941_s6 = inlined_call_operand.hbm [shape: f32[8,128], index: 6, kind: output, shape index: {}]  }
   0x1   :  { %12 = vsyncpa [#allocation4], 0  ;;  %s2606_s21 = smov [#allocation2]  }
   0x2   :  { %s20_s22 = sshll.u32 %s2606_s21, 4  ;;  %s21_s22 = int_to_ptr.vmem [resolvable:$true] %s20_s22 }
   0x3   :  { %s2570_s23 = scalar_lea.vmem %s21_s22, 18432  ;;  %p2575_p1 = scmp.lt.s32.totalorder %s21_s22, %s21_s22 }
   0x4   :  { %p2571_p0 = scmp.ne.s32.totalorder %s21_s22, %s2570_s23  ;;  %p2576_p2 = scmp.lt.s32.totalorder %s2570_s23, %s2570_s23 }
   0x6   :  { %p2577_p3 = por %p2576_p2, %p2575_p1 }
   0x8   :  { %p2578_p4 = pnand %p2577_p3, %p2571_p0 }
   0xa   :  { %2581 = shalt.err (!%p2578_p4)
}
   0xb   :  { %s2607_s24 = smov 192   ;;  %s2608_s25 = smov 12  }
   0xc   :  { %26 = dma.hbm_to_vmem [thread:$0]  %s2936_s1, 18432, %s21_s22, [#allocation3], %s2607_s24, %s2607_s24, %s2608_s25  }
   0xd   :  { %2602 = dma.done.wait [#allocation3], 18432  }
   0xe   :  { %2603 = vsyncadd [#allocation3], 4294948864  ;;  %v2272_v0 = vld [vmem:[#allocation2 + $0xac] ss:$12 sps:$4 sm:$0xff]   ;;  %v2276_v2 = vld [vmem:[#allocation2 + $0xa8] ss:$12 sps:$4 sm:$0xff]  }
   0xf   :  { %v2274_v1 = vld [vmem:[#allocation2 + $0x22c] ss:$12 sps:$4 sm:$0xff]   ;;  %1040 = vmatprep.subr.bf16.mxu0 %v2272_v0  ;;  %v2277_v3 = vld [vmem:[#allocation2 + $0x228] ss:$12 sps:$4 sm:$0xff]   ;;  %v2282_v6 = vld [vmem:[#allocation2 + $0x90] ss:$12 sps:$4 sm:$0xff]  }
  0x10   :  { %1081 = vmatprep.subr.bf16.mxu1 %v2274_v1  ;;  %v2278_v4 = vld [vmem:[#allocation2 + $0x94] ss:$12 sps:$4 sm:$0xff]   ;;  %1041 = vmatpush1.bf16.msra.mxu0 %v2276_v2  ;;  %v2283_v7 = vld [vmem:[#allocation2 + $0x210] ss:$12 sps:$4 sm:$0xff]   ;;  %v2288_v10 = vld [vmem:[#allocation2 + $0x78] ss:$12 sps:$4 sm:$0xff]  }
  0x11   :  { %1082 = vmatpush1.bf16.msra.mxu1 %v2277_v3  ;;  %v2280_v5 = vld [vmem:[#allocation2 + $0x214] ss:$12 sps:$4 sm:$0xff]   ;;  %1042 = vmatprep.subr.bf16.mxu0 %v2278_v4  ;;  %v2284_v8 = vld [vmem:[#allocation2 + $0x7c] ss:$12 sps:$4 sm:$0xff]   ;;  %v2289_v11 = vld [vmem:[#allocation2 + $0x1f8] ss:$12 sps:$4 sm:$0xff]  }
  0x12   :  { %1083 = vmatprep.subr.bf16.mxu1 %v2280_v5  ;;  %v2286_v9 = vld [vmem:[#allocation2 + $0x1fc] ss:$12 sps:$4 sm:$0xff]   ;;  %v2290_v12 = vld [vmem:[#allocation2 + $0x64] ss:$12 sps:$4 sm:$0xff]   ;;  %v2294_v14 = vld [vmem:[#allocation2 + $0x60] ss:$12 sps:$4 sm:$0xff]  }
  0x13   :  { %v2292_v13 = vld [vmem:[#allocation2 + $0x1e4] ss:$12 sps:$4 sm:$0xff]   ;;  %v2295_v15 = vld [vmem:[#allocation2 + $0x1e0] ss:$12 sps:$4 sm:$0xff]   ;;  %v2300_v18 = vld [vmem:[#allocation2 + $0x48] ss:$12 sps:$4 sm:$0xff]  }
  0x14   :  { %1043 = vmatpush1.bf16.msra.mxu0 %v2282_v6  ;;  %v2296_v16 = vld [vmem:[#allocation2 + $0x4c] ss:$12 sps:$4 sm:$0xff]   ;;  %v2301_v19 = vld [vmem:[#allocation2 + $0x1c8] ss:$12 sps:$4 sm:$0xff]   ;;  %v2306_v22 = vld [vmem:[#allocation2 + $0x30] ss:$12 sps:$4 sm:$0xff]  }
  0x15   :  { %1084 = vmatpush1.bf16.msra.mxu1 %v2283_v7  ;;  %1044 = vmatprep.subr.bf16.mxu0 %v2284_v8  ;;  %v2298_v17 = vld [vmem:[#allocation2 + $0x1cc] ss:$12 sps:$4 sm:$0xff]   ;;  %v2302_v20 = vld [vmem:[#allocation2 + $0x34] ss:$12 sps:$4 sm:$0xff]   ;;  %v2307_v23 = vld [vmem:[#allocation2 + $0x1b0] ss:$12 sps:$4 sm:$0xff]  }
  0x16   :  { %1085 = vmatprep.subr.bf16.mxu1 %v2286_v9  ;;  %v2304_v21 = vld [vmem:[#allocation2 + $0x1b4] ss:$12 sps:$4 sm:$0xff]   ;;  %v2308_v24 = vld [vmem:[#allocation2 + $0x1c] ss:$12 sps:$4 sm:$0xff]   ;;  %v2312_v26 = vld [vmem:[#allocation2 + $0x18] ss:$12 sps:$4 sm:$0xff]  }
  0x17   :  { %v2310_v25 = vld [vmem:[#allocation2 + $0x19c] ss:$12 sps:$4 sm:$0xff]   ;;  %v2313_v27 = vld [vmem:[#allocation2 + $0x198] ss:$12 sps:$4 sm:$0xff]   ;;  %v2318_v30 = vld [vmem:[#allocation2] ss:$12 sps:$4 sm:$0xff]  }
  0x18   :  { %1045 = vmatpush1.bf16.msra.mxu0 %v2288_v10  ;;  %v2314_v28 = vld [vmem:[#allocation2 + $0x4] ss:$12 sps:$4 sm:$0xff]   ;;  %v2319_v31 = vld [vmem:[#allocation2 + $0x180] ss:$12 sps:$4 sm:$0xff]   ;;  %v2324_v34 = vld [vmem:[#allocation2 + $0x168] ss:$12 sps:$4 sm:$0xff]  }
  0x19   :  { %1086 = vmatpush1.bf16.msra.mxu1 %v2289_v11  ;;  %1046 = vmatprep.subr.bf16.mxu0 %v2290_v12  ;;  %v2316_v29 = vld [vmem:[#allocation2 + $0x184] ss:$12 sps:$4 sm:$0xff]   ;;  %v2320_v32 = vld [vmem:[#allocation2 + $0x16c] ss:$12 sps:$4 sm:$0xff]   ;;  %v2325_v35 = vld [vmem:[#allocation2 + $0x2e8] ss:$12 sps:$4 sm:$0xff]  }
  0x1a   :  { %1087 = vmatprep.subr.bf16.mxu1 %v2292_v13  ;;  %v2322_v33 = vld [vmem:[#allocation2 + $0x2ec] ss:$12 sps:$4 sm:$0xff]   ;;  %v2326_v36 = vld [vmem:[#allocation2 + $0x154] ss:$12 sps:$4 sm:$0xff]   ;;  %v2330_v38 = vld [vmem:[#allocation2 + $0x150] ss:$12 sps:$4 sm:$0xff]  }
  0x1b   :  { %v2328_v37 = vld [vmem:[#allocation2 + $0x2d4] ss:$12 sps:$4 sm:$0xff]   ;;  %v2331_v39 = vld [vmem:[#allocation2 + $0x2d0] ss:$12 sps:$4 sm:$0xff]   ;;  %v2336_v42 = vld [vmem:[#allocation2 + $0x138] ss:$12 sps:$4 sm:$0xff]  }
  0x1c   :  { %1047 = vmatpush1.bf16.msra.mxu0 %v2294_v14  ;;  %v2332_v40 = vld [vmem:[#allocation2 + $0x13c] ss:$12 sps:$4 sm:$0xff]   ;;  %v2337_v43 = vld [vmem:[#allocation2 + $0x2b8] ss:$12 sps:$4 sm:$0xff]   ;;  %v2342_v46 = vld [vmem:[#allocation2 + $0x120] ss:$12 sps:$4 sm:$0xff]  }
  0x1d   :  { %1088 = vmatpush1.bf16.msra.mxu1 %v2295_v15  ;;  %1048 = vmatprep.subr.bf16.mxu0 %v2296_v16  ;;  %v2334_v41 = vld [vmem:[#allocation2 + $0x2bc] ss:$12 sps:$4 sm:$0xff]   ;;  %v2338_v44 = vld [vmem:[#allocation2 + $0x124] ss:$12 sps:$4 sm:$0xff]   ;;  %v2343_v50 = vld [vmem:[#allocation2 + $0x2a0] ss:$12 sps:$4 sm:$0xff]  }
  0x1e   :  { %1089 = vmatprep.subr.bf16.mxu1 %v2298_v17  ;;  %v2340_v45 = vld [vmem:[#allocation2 + $0x2a4] ss:$12 sps:$4 sm:$0xff]   ;;  %v40_v49 = vld [vmem:[%s2935_s0 + $0x8] sm:$0xff]  ;;  %v2350_v56 = vld [vmem:[#allocation2 + $0xf4] ss:$12 sps:$4 sm:$0xff]   ;;  %vm1777_vm0 = vcmask 523264  }
  0x1f   :  { %v39_v47 = vld [vmem:[%s2935_s0] sm:$0xff]  ;;  %v2344_v51 = vld [vmem:[#allocation2 + $0x10c] ss:$12 sps:$4 sm:$0xff]   ;;  %v2659_v52 = vcombine.high %v40_v49, %v40_v49  ;;  %v2348_v54 = vld [vmem:[#allocation2 + $0x108] ss:$12 sps:$4 sm:$0xff]   ;;  %v2665_v7 = vcombine.low %v40_v49, %v40_v49  ;;  %vm2611_vm1 = vmmov 0  }
  0x20   :  { %1049 = vmatpush1.bf16.msra.mxu0 %v2300_v18  ;;  %v2654_v48 = vcombine.high %v39_v47, %v39_v47  ;;  %v2346_v53 = vld [vmem:[#allocation2 + $0x28c] ss:$12 sps:$4 sm:$0xff]   ;;  %v2349_v55 = vld [vmem:[#allocation2 + $0x288] ss:$12 sps:$4 sm:$0xff]   ;;  %v2354_v58 = vld [vmem:[#allocation2 + $0xf0] ss:$12 sps:$4 sm:$0xff]   ;;  %v2663_v6 = vcombine.low %v39_v47, %v39_v47 }
  0x21   :  { %1090 = vmatpush1.bf16.msra.mxu1 %v2301_v19  ;;  %1050 = vmatprep.subr.bf16.mxu0 %v2302_v20  ;;  %v2352_v57 = vld [vmem:[#allocation2 + $0x274] ss:$12 sps:$4 sm:$0xff]   ;;  %v2355_v59 = vld [vmem:[#allocation2 + $0x270] ss:$12 sps:$4 sm:$0xff]   ;;  %v2360_v62 = vld [vmem:[#allocation2 + $0xd8] ss:$12 sps:$4 sm:$0xff]  }
  0x22   :  { %1091 = vmatprep.subr.bf16.mxu1 %v2304_v21  ;;  %1072 = vmatprep.mubr.bf16.mxu0 %v2654_v48  ;;  %v2356_v60 = vld [vmem:[#allocation2 + $0xdc] ss:$12 sps:$4 sm:$0xff]   ;;  %v2361_v63 = vld [vmem:[#allocation2 + $0x258] ss:$12 sps:$4 sm:$0xff]   ;;  %v2366_v2 = vld [vmem:[#allocation2 + $0xc0] ss:$12 sps:$4 sm:$0xff]  }
  0x23   :  { %1113 = vmatprep.mubr.bf16.mxu1 %v2659_v52  ;;  %v2358_v61 = vld [vmem:[#allocation2 + $0x25c] ss:$12 sps:$4 sm:$0xff]   ;;  %v2362_v0 = vld [vmem:[#allocation2 + $0xc4] ss:$12 sps:$4 sm:$0xff]   ;;  %v2367_v3 = vld [vmem:[#allocation2 + $0x240] ss:$12 sps:$4 sm:$0xff]  }
  0x24   :  { %1051 = vmatpush1.bf16.msra.mxu0 %v2306_v22  ;;  %v2364_v1 = vld [vmem:[#allocation2 + $0x244] ss:$12 sps:$4 sm:$0xff]   ;;  %v2374_v4 = vld [vmem:[#allocation2 + $0x3ac] ss:$12 sps:$4 sm:$0xff]   ;;  %v2372_v8 = vld [vmem:[#allocation2 + $0x3a8] ss:$12 sps:$4 sm:$0xff]  }
  0x25   :  { %1092 = vmatpush1.bf16.msra.mxu1 %v2307_v23  ;;  %1052 = vmatprep.subr.bf16.mxu0 %v2308_v24  ;;  %v2375_v5 = vld [vmem:[#allocation2 + $0x170] ss:$12 sps:$4 sm:$0xff]   ;;  %v2379_v10 = vld [vmem:[#allocation2 + $0x394] ss:$12 sps:$4 sm:$0xff]   ;;  %v2380_v11 = vld [vmem:[#allocation2 + $0x158] ss:$12 sps:$4 sm:$0xff]  }
  0x26   :  { %1093 = vmatprep.subr.bf16.mxu1 %v2310_v25  ;;  %v2376_v9 = vld [vmem:[#allocation2 + $0xb0] ss:$12 sps:$4 sm:$0xff]   ;;  %v2381_v13 = vld [vmem:[#allocation2 + $0x98] ss:$12 sps:$4 sm:$0xff]   ;;  %v2385_v15 = vld [vmem:[#allocation2 + $0x140] ss:$12 sps:$4 sm:$0xff]  }
  0x27   :  { %v2377_v12 = vld [vmem:[#allocation2 + $0x390] ss:$12 sps:$4 sm:$0xff]   ;;  %v2382_v16 = vld [vmem:[#allocation2 + $0x378] ss:$12 sps:$4 sm:$0xff]   ;;  %v2386_v17 = vld [vmem:[#allocation2 + $0x80] ss:$12 sps:$4 sm:$0xff]  }
  0x28   :  { %1053 = vmatpush1.bf16.msra.mxu0 %v2312_v26  ;;  %v2384_v14 = vld [vmem:[#allocation2 + $0x37c] ss:$12 sps:$4 sm:$0xff]   ;;  %v2389_v18 = vld [vmem:[#allocation2 + $0x364] ss:$12 sps:$4 sm:$0xff]   ;;  %v2387_v20 = vld [vmem:[#allocation2 + $0x360] ss:$12 sps:$4 sm:$0xff]  }
  0x29   :  { %1094 = vmatpush1.bf16.msra.mxu1 %v2313_v27  ;;  %1054 = vmatprep.subr.bf16.mxu0 %v2314_v28  ;;  %v2390_v19 = vld [vmem:[#allocation2 + $0x128] ss:$12 sps:$4 sm:$0xff]   ;;  %v2394_v22 = vld [vmem:[#allocation2 + $0x34c] ss:$12 sps:$4 sm:$0xff]   ;;  %v2395_v23 = vld [vmem:[#allocation2 + $0x110] ss:$12 sps:$4 sm:$0xff]  }
  0x2a   :  { %1095 = vmatprep.subr.bf16.mxu1 %v2316_v29  ;;  %v2391_v21 = vld [vmem:[#allocation2 + $0x68] ss:$12 sps:$4 sm:$0xff]   ;;  %v2396_v25 = vld [vmem:[#allocation2 + $0x50] ss:$12 sps:$4 sm:$0xff]   ;;  %v2400_v27 = vld [vmem:[#allocation2 + $0xf8] ss:$12 sps:$4 sm:$0xff]  }
  0x2b   :  { %v2392_v24 = vld [vmem:[#allocation2 + $0x348] ss:$12 sps:$4 sm:$0xff]   ;;  %v2397_v28 = vld [vmem:[#allocation2 + $0x330] ss:$12 sps:$4 sm:$0xff]   ;;  %v2401_v29 = vld [vmem:[#allocation2 + $0x38] ss:$12 sps:$4 sm:$0xff]  }
  0x2c   :  { %1055 = vmatpush1.bf16.msra.mxu0 %v2318_v30  ;;  %v2399_v26 = vld [vmem:[#allocation2 + $0x334] ss:$12 sps:$4 sm:$0xff]   ;;  %v2404_v30 = vld [vmem:[#allocation2 + $0x31c] ss:$12 sps:$4 sm:$0xff]   ;;  %v2421_v47 = vld [vmem:[#allocation2 + $0x218] ss:$12 sps:$4 sm:$0xff]  }
  0x2d   :  { %1096 = vmatpush1.bf16.msra.mxu1 %v2319_v31  ;;  %1056 = vmatprep.subr.bf16.mxu0 %v2320_v32  ;;  %v2405_v31 = vld [vmem:[#allocation2 + $0xe0] ss:$12 sps:$4 sm:$0xff]   ;;  %v2402_v32 = vld [vmem:[#allocation2 + $0x318] ss:$12 sps:$4 sm:$0xff]  }
  0x2e   :  { %1097 = vmatprep.subr.bf16.mxu1 %v2322_v33  ;;  %v2406_v33 = vld [vmem:[#allocation2 + $0x20] ss:$12 sps:$4 sm:$0xff]  }
  0x2f   :  { %v2425_v49 = vld [vmem:[#allocation2 + $0x2c0] ss:$12 sps:$4 sm:$0xff]  }
  0x30   :  { %1057 = vmatpush2.bf16.msra.mxu0 %v2324_v34  ;;  %v2409_v34 = vld [vmem:[#allocation2 + $0x304] ss:$12 sps:$4 sm:$0xff]  }
  0x31   :  { %1098 = vmatpush2.bf16.msra.mxu1 %v2325_v35  ;;  %1058 = vmatprep.subr.bf16.mxu0 %v2326_v36  ;;  %v2410_v35 = vld [vmem:[#allocation2 + $0xc8] ss:$12 sps:$4 sm:$0xff]   ;;  %v2407_v36 = vld [vmem:[#allocation2 + $0x300] ss:$12 sps:$4 sm:$0xff]  }
  0x32   :  { %1099 = vmatprep.subr.bf16.mxu1 %v2328_v37  ;;  %v2411_v37 = vld [vmem:[#allocation2 + $0x8] ss:$12 sps:$4 sm:$0xff]  }
  0x34   :  { %1059 = vmatpush2.bf16.msra.mxu0 %v2330_v38  ;;  %v2414_v38 = vld [vmem:[#allocation2 + $0x46c] ss:$12 sps:$4 sm:$0xff]  }
  0x35   :  { %1100 = vmatpush2.bf16.msra.mxu1 %v2331_v39  ;;  %1060 = vmatprep.subr.bf16.mxu0 %v2332_v40  ;;  %v2415_v39 = vld [vmem:[#allocation2 + $0x2f0] ss:$12 sps:$4 sm:$0xff]   ;;  %v2412_v40 = vld [vmem:[#allocation2 + $0x468] ss:$12 sps:$4 sm:$0xff]  }
  0x36   :  { %1101 = vmatprep.subr.bf16.mxu1 %v2334_v41  ;;  %v2416_v41 = vld [vmem:[#allocation2 + $0x230] ss:$12 sps:$4 sm:$0xff]  }
  0x38   :  { %1061 = vmatpush2.bf16.msra.mxu0 %v2336_v42  ;;  %v2419_v42 = vld [vmem:[#allocation2 + $0x454] ss:$12 sps:$4 sm:$0xff]  }
  0x39   :  { %1102 = vmatpush2.bf16.msra.mxu1 %v2337_v43  ;;  %1062 = vmatprep.subr.bf16.mxu0 %v2338_v44  ;;  %v2673_v43 = vld [vmem:[%s2935_s0 + $0x10] sm:$0xff]  ;;  %v2420_v44 = vld [vmem:[#allocation2 + $0x2d8] ss:$12 sps:$4 sm:$0xff]  }
  0x3a   :  { %1103 = vmatprep.subr.bf16.mxu1 %v2340_v45  ;;  %v2677_v45 = vcombine.high %v2673_v43, %v2673_v43 }
  0x3c   :  { %1063 = vmatpush2.bf16.msra.mxu0 %v2342_v46  ;;  %v2417_v46 = vld [vmem:[#allocation2 + $0x450] ss:$12 sps:$4 sm:$0xff]  }
  0x3d   :  { %1104 = vmatpush2.bf16.msra.mxu1 %v2343_v50  ;;  %1064 = vmatprep.subr.bf16.mxu0 %v2344_v51  ;;  %v2422_v50 = vld [vmem:[#allocation2 + $0x438] ss:$12 sps:$4 sm:$0xff]   ;;  %v2426_v51 = vld [vmem:[#allocation2 + $0x200] ss:$12 sps:$4 sm:$0xff]  }
  0x3e   :  { %1105 = vmatprep.subr.bf16.mxu1 %v2346_v53  ;;  %v2429_v53 = vld [vmem:[#allocation2 + $0x424] ss:$12 sps:$4 sm:$0xff]  }
  0x40   :  { %1065 = vmatpush2.bf16.msra.mxu0 %v2348_v54  ;;  %v2430_v54 = vld [vmem:[#allocation2 + $0x2a8] ss:$12 sps:$4 sm:$0xff]  }
  0x41   :  { %1106 = vmatpush2.bf16.msra.mxu1 %v2349_v55  ;;  %1066 = vmatprep.subr.bf16.mxu0 %v2350_v56  ;;  %v2427_v55 = vld [vmem:[#allocation2 + $0x420] ss:$12 sps:$4 sm:$0xff]   ;;  %v2431_v56 = vld [vmem:[#allocation2 + $0x1e8] ss:$12 sps:$4 sm:$0xff]  }
  0x42   :  { %1107 = vmatprep.subr.bf16.mxu1 %v2352_v57  ;;  %v2434_v57 = vld [vmem:[#allocation2 + $0x40c] ss:$12 sps:$4 sm:$0xff]  }
  0x44   :  { %1067 = vmatpush2.bf16.msra.mxu0 %v2354_v58  ;;  %v2435_v58 = vld [vmem:[#allocation2 + $0x290] ss:$12 sps:$4 sm:$0xff]  }
  0x45   :  { %1108 = vmatpush2.bf16.msra.mxu1 %v2355_v59  ;;  %1068 = vmatprep.subr.bf16.mxu0 %v2356_v60  ;;  %v2432_v59 = vld [vmem:[#allocation2 + $0x408] ss:$12 sps:$4 sm:$0xff]   ;;  %v2436_v60 = vld [vmem:[#allocation2 + $0x1d0] ss:$12 sps:$4 sm:$0xff]  }
  0x46   :  { %1109 = vmatprep.subr.bf16.mxu1 %v2358_v61  ;;  %v2440_v61 = vld [vmem:[#allocation2 + $0x278] ss:$12 sps:$4 sm:$0xff]  }
  0x48   :  { %1069 = vmatpush2.bf16.msra.mxu0 %v2360_v62  ;;  %v2437_v62 = vld [vmem:[#allocation2 + $0x3f0] ss:$12 sps:$4 sm:$0xff]  }
  0x49   :  { %1110 = vmatpush2.bf16.msra.mxu1 %v2361_v63  ;;  %1070 = vmatprep.subr.bf16.mxu0 %v2362_v0  ;;  %v2441_v63 = vld [vmem:[#allocation2 + $0x1b8] ss:$12 sps:$4 sm:$0xff]   ;;  %v2444_v0 = vld [vmem:[#allocation2 + $0x3dc] ss:$12 sps:$4 sm:$0xff]  }
  0x4a   :  { %1111 = vmatprep.subr.bf16.mxu1 %v2364_v1  ;;  %v2445_v1 = vld [vmem:[#allocation2 + $0x260] ss:$12 sps:$4 sm:$0xff]  }
  0x4c   :  { %1071 = vmatpush2.bf16.msra.mxu0 %v2366_v2  ;;  %v2442_v2 = vld [vmem:[#allocation2 + $0x3d8] ss:$12 sps:$4 sm:$0xff]  }
  0x4d   :  { %1112 = vmatpush2.bf16.msra.mxu1 %v2367_v3  ;;  %1122 = vmatprep.subr.bf16.mxu0 %v2374_v4  ;;  %v2446_v3 = vld [vmem:[#allocation2 + $0x1a0] ss:$12 sps:$4 sm:$0xff]   ;;  %v2449_v4 = vld [vmem:[#allocation2 + $0x3c4] ss:$12 sps:$4 sm:$0xff]  }
  0x4e   :  { %2170 = vmatprep.subr.bf16.mxu1 %v2375_v5  ;;  %v2450_v5 = vld [vmem:[#allocation2 + $0x248] ss:$12 sps:$4 sm:$0xff]  }
  0x4f   :  { %1073 = vmatmul.mubr.bf16.vlgmr.msra.gmra.mxu0 %v2663_v6 }
  0x50   :  { %1114 = vmatmul.mubr.bf16.vlgmr.msra.gmra.mxu1 %v2665_v7  ;;  %1123 = vmatpush1.bf16.msra.mxu0 %v2372_v8  ;;  %v2451_v8 = vld [vmem:[#allocation2 + $0x188] ss:$12 sps:$4 sm:$0xff]  }
  0x51   :  { %2171 = vmatpush3.bf16.msra.mxu1 %v2376_v9  ;;  %1124 = vmatprep.subr.bf16.mxu0 %v2379_v10  ;;  %v2454_v9 = vld [vmem:[#allocation2 + $0x470] ss:$12 sps:$4 sm:$0xff]  }
  0x52   :  { %2172 = vmatprep.subr.bf16.mxu1 %v2380_v11  ;;  %1195 = vmatprep.mubr.bf16.mxu1 %v2654_v48  ;;  %v2424_v48 = vld [vmem:[#allocation2 + $0x43c] ss:$12 sps:$4 sm:$0xff]   ;;  %v2684_v11 = vcombine.low %v2673_v43, %v2673_v43  ;;  %v2499_v43 = vld [vmem:[%s2937_s2 + $0xe4] ss:$8 sps:$4 sm:$0xff]  }
  0x53   :  { %1154 = vmatprep.mubr.bf16.mxu0 %v2677_v45  ;;  %v2455_v10 = vld [vmem:[#allocation2 + $0x3b0] ss:$12 sps:$4 sm:$0xff]  }
  0x54   :  { %1125 = vmatpush1.bf16.msra.mxu0 %v2377_v12  ;;  %v2456_v12 = vld [vmem:[#allocation2 + $0x458] ss:$12 sps:$4 sm:$0xff]  }
  0x55   :  { %2173 = vmatpush3.bf16.msra.mxu1 %v2381_v13  ;;  %1126 = vmatprep.subr.bf16.mxu0 %v2384_v14  ;;  %v2457_v13 = vld [vmem:[#allocation2 + $0x398] ss:$12 sps:$4 sm:$0xff]   ;;  %v2458_v14 = vld [vmem:[#allocation2 + $0x440] ss:$12 sps:$4 sm:$0xff]  }
  0x56   :  { %2174 = vmatprep.subr.bf16.mxu1 %v2385_v15  ;;  %v2459_v15 = vld [vmem:[#allocation2 + $0x380] ss:$12 sps:$4 sm:$0xff]  }
  0x58   :  { %1127 = vmatpush1.bf16.msra.mxu0 %v2382_v16  ;;  %v2460_v16 = vld [vmem:[#allocation2 + $0x428] ss:$12 sps:$4 sm:$0xff]  }
  0x59   :  { %2175 = vmatpush3.bf16.msra.mxu1 %v2386_v17  ;;  %1128 = vmatprep.subr.bf16.mxu0 %v2389_v18  ;;  %v2470_v17 = vld [vmem:[%s2937_s2 + $0x70] ss:$8 sps:$4 sm:$0xff]   ;;  %v2472_v18 = vld [vmem:[%s2937_s2 + $0x74] ss:$8 sps:$4 sm:$0xff]  }
  0x5a   :  { %2176 = vmatprep.subr.bf16.mxu1 %v2390_v19  ;;  %v2461_v19 = vld [vmem:[#allocation2 + $0x368] ss:$12 sps:$4 sm:$0xff]  }
  0x5c   :  { %1129 = vmatpush1.bf16.msra.mxu0 %v2387_v20  ;;  %v2473_v20 = vld [vmem:[%s2937_s2 + $0x60] ss:$8 sps:$4 sm:$0xff]  }
  0x5d   :  { %2177 = vmatpush3.bf16.msra.mxu1 %v2391_v21  ;;  %1130 = vmatprep.subr.bf16.mxu0 %v2394_v22  ;;  %v2462_v21 = vld [vmem:[#allocation2 + $0x410] ss:$12 sps:$4 sm:$0xff]  }
  0x5e   :  { %2178 = vmatprep.subr.bf16.mxu1 %v2395_v23  ;;  %v2478_v22 = vld [vmem:[%s2937_s2 + $0x54] ss:$8 sps:$4 sm:$0xff]  }
  0x5f   :  { %v2463_v23 = vld [vmem:[#allocation2 + $0x350] ss:$12 sps:$4 sm:$0xff]  }
  0x60   :  { %1131 = vmatpush1.bf16.msra.mxu0 %v2392_v24  ;;  %v2464_v24 = vld [vmem:[#allocation2 + $0x3f8] ss:$12 sps:$4 sm:$0xff]  }
  0x61   :  { %2179 = vmatpush3.bf16.msra.mxu1 %v2396_v25  ;;  %1132 = vmatprep.subr.bf16.mxu0 %v2399_v26  ;;  %v2476_v25 = vld [vmem:[%s2937_s2 + $0x50] ss:$8 sps:$4 sm:$0xff]   ;;  %v2481_v26 = vld [vmem:[%s2937_s2 + $0x44] ss:$8 sps:$4 sm:$0xff]  }
  0x62   :  { %2180 = vmatprep.subr.bf16.mxu1 %v2400_v27  ;;  %v2465_v27 = vld [vmem:[#allocation2 + $0x338] ss:$12 sps:$4 sm:$0xff]  }
  0x64   :  { %1133 = vmatpush1.bf16.msra.mxu0 %v2397_v28  ;;  %v2479_v28 = vld [vmem:[%s2937_s2 + $0x40] ss:$8 sps:$4 sm:$0xff]  }
  0x65   :  { %2181 = vmatpush3.bf16.msra.mxu1 %v2401_v29  ;;  %1134 = vmatprep.subr.bf16.mxu0 %v2404_v30  ;;  %v2466_v29 = vld [vmem:[#allocation2 + $0x3e0] ss:$12 sps:$4 sm:$0xff]   ;;  %v2484_v30 = vld [vmem:[%s2937_s2 + $0x34] ss:$8 sps:$4 sm:$0xff]  }
  0x66   :  { %2182 = vmatprep.subr.bf16.mxu1 %v2405_v31  ;;  %v2467_v31 = vld [vmem:[#allocation2 + $0x320] ss:$12 sps:$4 sm:$0xff]  }
  0x68   :  { %1135 = vmatpush1.bf16.msra.mxu0 %v2402_v32  ;;  %v2482_v32 = vld [vmem:[%s2937_s2 + $0x30] ss:$8 sps:$4 sm:$0xff]  }
  0x69   :  { %2183 = vmatpush3.bf16.msra.mxu1 %v2406_v33  ;;  %1136 = vmatprep.subr.bf16.mxu0 %v2409_v34  ;;  %v2468_v33 = vld [vmem:[#allocation2 + $0x3c8] ss:$12 sps:$4 sm:$0xff]   ;;  %v2487_v34 = vld [vmem:[%s2937_s2 + $0x24] ss:$8 sps:$4 sm:$0xff]  }
  0x6a   :  { %2184 = vmatprep.subr.bf16.mxu1 %v2410_v35  ;;  %v2469_v35 = vld [vmem:[#allocation2 + $0x308] ss:$12 sps:$4 sm:$0xff]  }
  0x6c   :  { %1137 = vmatpush1.bf16.msra.mxu0 %v2407_v36  ;;  %v2485_v36 = vld [vmem:[%s2937_s2 + $0x20] ss:$8 sps:$4 sm:$0xff]  }
  0x6d   :  { %2185 = vmatpush3.bf16.msra.mxu1 %v2411_v37  ;;  %1138 = vmatprep.subr.bf16.mxu0 %v2414_v38  ;;  %v2490_v37 = vld [vmem:[%s2937_s2 + $0x14] ss:$8 sps:$4 sm:$0xff]   ;;  %v2488_v38 = vld [vmem:[%s2937_s2 + $0x10] ss:$8 sps:$4 sm:$0xff]  }
  0x6e   :  { %2192 = vmatprep.subr.bf16.mxu1 %v2415_v39  ;;  %v2493_v39 = vld [vmem:[%s2937_s2 + $0x4] ss:$8 sps:$4 sm:$0xff]  }
  0x70   :  { %1196 = vmatmul.mubr.bf16.vlgmr.msra.gmra.mxu1 %v2663_v6  ;;  %1139 = vmatpush2.bf16.msra.mxu0 %v2412_v40  ;;  %v2447_v6 = vld [vmem:[#allocation2 + $0x3c0] ss:$12 sps:$4 sm:$0xff]  }
  0x71   :  { %2193 = vmatpush3.bf16.msra.mxu1 %v2416_v41  ;;  %1140 = vmatprep.subr.bf16.mxu0 %v2419_v42  ;;  %v2491_v40 = vld [vmem:[%s2937_s2] ss:$8 sps:$4 sm:$0xff]   ;;  %v2496_v41 = vld [vmem:[%s2937_s2 + $0xf4] ss:$8 sps:$4 sm:$0xff]   ;;  %v2494_v42 = vld [vmem:[%s2937_s2 + $0xf0] ss:$8 sps:$4 sm:$0xff]  }
  0x72   :  { %2194 = vmatprep.subr.bf16.mxu1 %v2420_v44  ;;  %1235 = vmatprep.mubr.bf16.mxu1 %v2659_v52  ;;  %v2439_v52 = vld [vmem:[#allocation2 + $0x3f4] ss:$12 sps:$4 sm:$0xff]  }
  0x73   :  { %v2497_v44 = vld [vmem:[%s2937_s2 + $0xe0] ss:$8 sps:$4 sm:$0xff]  }
  0x74   :  { %1141 = vmatpush2.bf16.msra.mxu0 %v2417_v46  ;;  %v2500_v46 = vld [vmem:[%s2937_s2 + $0xd0] ss:$8 sps:$4 sm:$0xff]  }
  0x75   :  { %2195 = vmatpush3.bf16.msra.mxu1 %v2421_v47  ;;  %1142 = vmatprep.subr.bf16.mxu0 %v2424_v48  ;;  %v2505_v47 = vld [vmem:[%s2937_s2 + $0xc4] ss:$8 sps:$4 sm:$0xff]   ;;  %v2503_v48 = vld [vmem:[%s2937_s2 + $0xc0] ss:$8 sps:$4 sm:$0xff]  }
  0x76   :  { %2196 = vmatprep.subr.bf16.mxu1 %v2425_v49  ;;  %v2508_v49 = vld [vmem:[%s2937_s2 + $0xb4] ss:$8 sps:$4 sm:$0xff]  }
  0x78   :  { %1143 = vmatpush2.bf16.msra.mxu0 %v2422_v50  ;;  %v2506_v50 = vld [vmem:[%s2937_s2 + $0xb0] ss:$8 sps:$4 sm:$0xff]  }
  0x79   :  { %2197 = vmatpush3.bf16.msra.mxu1 %v2426_v51  ;;  %1144 = vmatprep.subr.bf16.mxu0 %v2429_v53  ;;  %v2511_v51 = vld [vmem:[%s2937_s2 + $0xa4] ss:$8 sps:$4 sm:$0xff]   ;;  %v2509_v53 = vld [vmem:[%s2937_s2 + $0xa0] ss:$8 sps:$4 sm:$0xff]  }
  0x7a   :  { %2198 = vmatprep.subr.bf16.mxu1 %v2430_v54  ;;  %v2514_v54 = vld [vmem:[%s2937_s2 + $0x94] ss:$8 sps:$4 sm:$0xff]  }
  0x7c   :  { %1145 = vmatpush2.bf16.msra.mxu0 %v2427_v55  ;;  %v2512_v55 = vld [vmem:[%s2937_s2 + $0x90] ss:$8 sps:$4 sm:$0xff]  }
  0x7d   :  { %2199 = vmatpush3.bf16.msra.mxu1 %v2431_v56  ;;  %1146 = vmatprep.subr.bf16.mxu0 %v2434_v57  ;;  %v2517_v56 = vld [vmem:[%s2937_s2 + $0x84] ss:$8 sps:$4 sm:$0xff]   ;;  %v2515_v57 = vld [vmem:[%s2937_s2 + $0x80] ss:$8 sps:$4 sm:$0xff]  }
  0x7e   :  { %2200 = vmatprep.subr.bf16.mxu1 %v2435_v58  ;;  %v2520_v58 = vld [vmem:[%s2937_s2 + $0x174] ss:$8 sps:$4 sm:$0xff]  }
  0x80   :  { %1147 = vmatpush2.bf16.msra.mxu0 %v2432_v59  ;;  %v2518_v59 = vld [vmem:[%s2937_s2 + $0x170] ss:$8 sps:$4 sm:$0xff]  }
  0x81   :  { %2201 = vmatpush3.bf16.msra.mxu1 %v2436_v60  ;;  %1148 = vmatprep.subr.bf16.mxu0 %v2439_v52  ;;  %v2523_v60 = vld [vmem:[%s2937_s2 + $0x164] ss:$8 sps:$4 sm:$0xff]   ;;  %v2521_v52 = vld [vmem:[%s2937_s2 + $0x160] ss:$8 sps:$4 sm:$0xff]  }
  0x82   :  { %2202 = vmatprep.subr.bf16.mxu1 %v2440_v61  ;;  %v2526_v61 = vld [vmem:[%s2937_s2 + $0x154] ss:$8 sps:$4 sm:$0xff]  }
  0x84   :  { %1149 = vmatpush2.bf16.msra.mxu0 %v2437_v62  ;;  %v2524_v62 = vld [vmem:[%s2937_s2 + $0x150] ss:$8 sps:$4 sm:$0xff]  }
  0x85   :  { %2203 = vmatpush3.bf16.msra.mxu1 %v2441_v63  ;;  %1150 = vmatprep.subr.bf16.mxu0 %v2444_v0  ;;  %v2529_v63 = vld [vmem:[%s2937_s2 + $0x144] ss:$8 sps:$4 sm:$0xff]   ;;  %v2527_v0 = vld [vmem:[%s2937_s2 + $0x140] ss:$8 sps:$4 sm:$0xff]  }
  0x86   :  { %2204 = vmatprep.subr.bf16.mxu1 %v2445_v1  ;;  %v2532_v1 = vld [vmem:[%s2937_s2 + $0x134] ss:$8 sps:$4 sm:$0xff]  }
  0x88   :  { %1151 = vmatpush2.bf16.msra.mxu0 %v2442_v2  ;;  %v2530_v2 = vld [vmem:[%s2937_s2 + $0x130] ss:$8 sps:$4 sm:$0xff]  }
  0x89   :  { %2205 = vmatpush3.bf16.msra.mxu1 %v2446_v3  ;;  %1152 = vmatprep.subr.bf16.mxu0 %v2449_v4  ;;  %v2535_v3 = vld [vmem:[%s2937_s2 + $0x124] ss:$8 sps:$4 sm:$0xff]   ;;  %v2533_v4 = vld [vmem:[%s2937_s2 + $0x120] ss:$8 sps:$4 sm:$0xff]  }
  0x8a   :  { %2206 = vmatprep.subr.bf16.mxu1 %v2450_v5  ;;  %v2538_v5 = vld [vmem:[%s2937_s2 + $0x114] ss:$8 sps:$4 sm:$0xff]  }
  0x8c   :  { %1153 = vmatpush2.bf16.msra.mxu0 %v2447_v6  ;;  %v2536_v6 = vld [vmem:[%s2937_s2 + $0x110] ss:$8 sps:$4 sm:$0xff]  }
  0x8d   :  { %2207 = vmatpush3.bf16.msra.mxu1 %v2451_v8  ;;  %2214 = vmatprep.subr.bf16.mxu0 %v2454_v9  ;;  %v2541_v8 = vld [vmem:[%s2937_s2 + $0x104] ss:$8 sps:$4 sm:$0xff]   ;;  %v2539_v9 = vld [vmem:[%s2937_s2 + $0x100] ss:$8 sps:$4 sm:$0xff]  }
  0x8e   :  { %1590 = vmatprep.subr.bf16.mxu1 %v2472_v18 }
  0x8f   :  { %1155 = vmatmul.mubr.bf16.vlgmr.msra.gmra.mxu0 %v2684_v11 }
  0x90   :  { %1236 = vmatmul.mubr.bf16.vlgmr.msra.gmra.mxu1 %v2665_v7  ;;  %2215 = vmatpush3.bf16.msra.mxu0 %v2455_v10  ;;  %v2475_v7 = vld [vmem:[%s2937_s2 + $0x64] ss:$8 sps:$4 sm:$0xff]   ;;  %v2609_v10 = vmov 0  }
  0x91   :  { %1275 = vmatprep.mubr.bf16.mxu0 %v2677_v45  ;;  %2216 = vmatprep.subr.bf16.mxu0 %v2456_v12  ;;  %v2502_v45 = vld [vmem:[%s2937_s2 + $0xd4] ss:$8 sps:$4 sm:$0xff]  }
  0x92   :  { %1591 = vmatpush1.bf16.msra.mxu1 %v2470_v17 }
  0x93   :  { %1592 = vmatprep.subr.bf16.mxu1 %v2475_v7 }
  0x94   :  { %2217 = vmatpush3.bf16.msra.mxu0 %v2457_v13 }
  0x95   :  { %2218 = vmatprep.subr.bf16.mxu0 %v2458_v14 }
  0x96   :  { %1593 = vmatpush1.bf16.msra.mxu1 %v2473_v20 }
  0x97   :  { %1594 = vmatprep.subr.bf16.mxu1 %v2478_v22  ;;  %v236_v22 = vlaneseq }
  0x98   :  { %2219 = vmatpush3.bf16.msra.mxu0 %v2459_v15 }
  0x99   :  { %2220 = vmatprep.subr.bf16.mxu0 %v2460_v16 }
  0x9a   :  { %1595 = vmatpush1.bf16.msra.mxu1 %v2476_v25  ;;  %v234_v25 = vld [vmem:[%s2940_s5] ss:$4 sm:$0x7] }
  0x9b   :  { %1596 = vmatprep.subr.bf16.mxu1 %v2481_v26 }
  0x9c   :  { %2221 = vmatpush3.bf16.msra.mxu0 %v2461_v19 }
  0x9d   :  { %2222 = vmatprep.subr.bf16.mxu0 %v2462_v21 }
  0x9e   :  { %1597 = vmatpush1.bf16.msra.mxu1 %v2479_v28 }
  0x9f   :  { %1598 = vmatprep.subr.bf16.mxu1 %v2484_v30 }
  0xa0   :  { %2223 = vmatpush3.bf16.msra.mxu0 %v2463_v23  ;;  %v2836_v23 = vshrl.u32 %v236_v22, 7 }
  0xa1   :  { %2224 = vmatprep.subr.bf16.mxu0 %v2464_v24 }
  0xa2   :  { %1599 = vmatpush1.bf16.msra.mxu1 %v2482_v32  ;;  %v238_v24 = vsub.s32 0, %v2836_v23  ;;  %v242_v26 = vsub.s32 1, %v2836_v23 }
  0xa3   :  { %1600 = vmatprep.subr.bf16.mxu1 %v2487_v34 }
  0xa4   :  { %2225 = vmatpush3.bf16.msra.mxu0 %v2465_v27  ;;  %v239_v27 = vrot.slane %v234_v25, %v238_v24  ;;  %v243_v28 = vrot.slane %v234_v25, %v242_v26 }
  0xa5   :  { %2226 = vmatprep.subr.bf16.mxu0 %v2466_v29 }
  0xa6   :  { %1601 = vmatpush1.bf16.msra.mxu1 %v2485_v36 }
  0xa7   :  { %1602 = vmatprep.subr.bf16.mxu1 %v2490_v37 }
  0xa8   :  { %2227 = vmatpush3.bf16.msra.mxu0 %v2467_v31 }
  0xa9   :  { %2228 = vmatprep.subr.bf16.mxu0 %v2468_v33 }
  0xaa   :  { %1603 = vmatpush1.bf16.msra.mxu1 %v2488_v38 }
  0xab   :  { %1604 = vmatprep.subr.bf16.mxu1 %v2493_v39 }
  0xac   :  { %2229 = vmatpush3.bf16.msra.mxu0 %v2469_v35 }
  0xad   :  { %1631 = vmatprep.subr.bf16.mxu0 %v2520_v58 }
  0xae   :  { %1605 = vmatpush1.bf16.msra.mxu1 %v2491_v40 }
  0xaf   :  { %1276 = vmatmul.mubr.bf16.vlgmr.msra.gmra.mxu0 %v2684_v11  ;;  %1606 = vmatprep.subr.bf16.mxu1 %v2496_v41 }
  0xb0   :  { %1632 = vmatpush1.bf16.msra.mxu0 %v2518_v59  ;;  %1663 = vmatprep.mubr.bf16.mxu0 %v2609_v10 }
  0xb1   :  { %1633 = vmatprep.subr.bf16.mxu0 %v2523_v60 }
  0xb2   :  { %1607 = vmatpush2.bf16.msra.mxu1 %v2494_v42 }
  0xb3   :  { %1608 = vmatprep.subr.bf16.mxu1 %v2499_v43 }
  0xb4   :  { %1634 = vmatpush1.bf16.msra.mxu0 %v2521_v52  ;;  %v2542_v52 = vld [vmem:[%s2938_s3 + $0x38] sm:$0xff]  }
  0xb5   :  { %1635 = vmatprep.subr.bf16.mxu0 %v2526_v61 }
  0xb6   :  { %1609 = vmatpush2.bf16.msra.mxu1 %v2497_v44 }
  0xb7   :  { %1610 = vmatprep.subr.bf16.mxu1 %v2502_v45 }
  0xb8   :  { %1636 = vmatpush1.bf16.msra.mxu0 %v2524_v62  ;;  %v2543_v62 = vld [vmem:[%s2938_s3 + $0x30] sm:$0xff]  }
  0xb9   :  { %1637 = vmatprep.subr.bf16.mxu0 %v2529_v63  ;;  %v2544_v63 = vld [vmem:[%s2938_s3 + $0x28] sm:$0xff]  }
  0xba   :  { %1611 = vmatpush2.bf16.msra.mxu1 %v2500_v46 }
  0xbb   :  { %1612 = vmatprep.subr.bf16.mxu1 %v2505_v47  ;;  %v246_v47 = vsub.s32 2, %v2836_v23  ;;  %v2560_v23 = vld [vmem:[%s2939_s4 + $0x8] sm:$0xff]  }
  0xbc   :  { %1638 = vmatpush1.bf16.msra.mxu0 %v2527_v0  ;;  %v2545_v0 = vld [vmem:[%s2938_s3 + $0x20] sm:$0xff]  }
  0xbd   :  { %1639 = vmatprep.subr.bf16.mxu0 %v2532_v1  ;;  %v2546_v1 = vld [vmem:[%s2938_s3 + $0x18] sm:$0xff]  }
  0xbe   :  { %1613 = vmatpush2.bf16.msra.mxu1 %v2503_v48  ;;  %v247_v48 = vrot.slane %v234_v25, %v246_v47 }
  0xbf   :  { %1614 = vmatprep.subr.bf16.mxu1 %v2508_v49 }
  0xc0   :  { %1640 = vmatpush1.bf16.msra.mxu0 %v2530_v2  ;;  %v2547_v2 = vld [vmem:[%s2938_s3 + $0x10] sm:$0xff]  }
  0xc1   :  { %1641 = vmatprep.subr.bf16.mxu0 %v2535_v3  ;;  %v2548_v3 = vld [vmem:[%s2938_s3 + $0x8] sm:$0xff]  }
  0xc2   :  { %1615 = vmatpush2.bf16.msra.mxu1 %v2506_v50 }
  0xc3   :  { %1616 = vmatprep.subr.bf16.mxu1 %v2511_v51 }
  0xc4   :  { %1642 = vmatpush1.bf16.msra.mxu0 %v2533_v4  ;;  %v2549_v4 = vld [vmem:[%s2938_s3] sm:$0xff]  }
  0xc5   :  { %1643 = vmatprep.subr.bf16.mxu0 %v2538_v5  ;;  %v2550_v5 = vld [vmem:[%s2938_s3 + $0x58] sm:$0xff]  }
  0xc6   :  { %1617 = vmatpush2.bf16.msra.mxu1 %v2509_v53 }
  0xc7   :  { %1618 = vmatprep.subr.bf16.mxu1 %v2514_v54 }
  0xc8   :  { %1644 = vmatpush1.bf16.msra.mxu0 %v2536_v6  ;;  %v2551_v6 = vld [vmem:[%s2938_s3 + $0x50] sm:$0xff]  }
  0xc9   :  { %1645 = vmatprep.subr.bf16.mxu0 %v2541_v8  ;;  %v2552_v8 = vld [vmem:[%s2938_s3 + $0x48] sm:$0xff]  }
  0xca   :  { %1619 = vmatpush2.bf16.msra.mxu1 %v2512_v55 }
  0xcb   :  { %1620 = vmatprep.subr.bf16.mxu1 %v2517_v56 }
  0xcc   :  { %1646 = vmatpush1.bf16.msra.mxu0 %v2539_v9  ;;  %v2553_v9 = vld [vmem:[%s2938_s3 + $0x40] sm:$0xff]  }
  0xcd   :  { %1781 = vmatprep.subr.bf16.mxu0 %v2609_v10 }
  0xce   :  { %1621 = vmatpush2.bf16.msra.mxu1 %v2515_v57 }
 0x10f   :  { %v1074_v11 = vpop.f32.mrf.mxu0 }
 0x110   :  { %v1115_v12 = vpop.f32.mrf.mxu1  ;;  %v1075_v29 = vadd.f32 %v1074_v11, %v239_v27  ;;  %v2554_v11 = vld [vmem:[%s2939_s4 + $0x38] sm:$0xff]  }
 0x111   :  { %v1076_v13 = vpop.f32.mrf.mxu0 }
 0x112   :  { %v1117_v14 = vpop.f32.mrf.mxu1  ;;  %v1077_v30 = vadd.f32 %v1076_v13, %v243_v28  ;;  %v1116_v31 = vadd.f32 %v1115_v12, %v1075_v29  ;;  %v2610_v12 = vmov 0.0   ;;  %v2555_v13 = vld [vmem:[%s2939_s4 + $0x30] sm:$0xff]  }
 0x113   :  { %v1078_v15 = vpop.f32.mrf.mxu0  ;;  %2245 = vmatprep.subr.bf16.mxu1 %v2610_v12 }
 0x114   :  { %v1119_v16 = vpop.f32.mrf.mxu1  ;;  %v1118_v34 = vadd.f32 %v1117_v14, %v1077_v30  ;;  %v2557_v14 = vld [vmem:[%s2939_s4 + $0x20] sm:$0xff]   ;;  %v2558_v15 = vld [vmem:[%s2939_s4 + $0x18] sm:$0xff]  }
 0x115   :  { %v1079_v17 = vpop.f32.mrf.mxu0  ;;  %v2559_v16 = vld [vmem:[%s2939_s4 + $0x10] sm:$0xff]  }
 0x116   :  { %v1120_v18 = vpop.f32.mrf.mxu1 }
 0x130   :  { %v2186_v7 = vpop.f32.mrf.mxu1 }
 0x132   :  { %v2187_v19 = vpop.f32.mrf.mxu1 }
 0x133   :  { %v2188_v49 = vadd.f32 %v2187_v19, %v2186_v7 }
 0x134   :  { %v2189_v20 = vpop.f32.mrf.mxu1 }
 0x135   :  { %v1198_v50 = vadd.f32 %v2188_v49, %v247_v48  ;;  %v2098_v20 = vld [vmem:[%s2940_s5 + $0x1] ss:$4 sm:$0x3] }
 0x136   :  { %v2190_v21 = vpop.f32.mrf.mxu1  ;;  %v1347_v22 = vrot.slane %v2098_v20, %v242_v26  ;;  %v2147_v26 = vld [vmem:[%s2940_s5 + $0x2] ss:$0 sm:$0xff] }
 0x137   :  { %v1343_v21 = vrot.slane %v2098_v20, %v238_v24  ;;  %v2561_v24 = vld [vmem:[%s2939_s4] sm:$0xff]  }
 0x14f   :  { %v1156_v32 = vpop.f32.mrf.mxu0 }
 0x150   :  { %v2208_v33 = vpop.f32.mrf.mxu1  ;;  %v1157_v35 = vadd.f32 %v1156_v32, %v1116_v31 }
 0x151   :  { %v1158_v36 = vpop.f32.mrf.mxu0 }
 0x152   :  { %v2209_v37 = vpop.f32.mrf.mxu1  ;;  %v1159_v38 = vadd.f32 %v1158_v36, %v1118_v34  ;;  %v1283_v39 = vmax.f32 %v1157_v35, 0.0 }
 0x153   :  { %v1160_v40 = vpop.f32.mrf.mxu0  ;;  %v2210_v51 = vadd.f32 %v2209_v37, %v2208_v33 }
 0x154   :  { %v2211_v41 = vpop.f32.mrf.mxu1  ;;  %v1284_v42 = vmax.f32 %v1159_v38, 0.0  ;;  %v1286_v46 = vpack.c.bf16 %v1283_v39, %v1283_v39 }
 0x155   :  { %v1161_v43 = vpop.f32.mrf.mxu0  ;;  %v1238_v55 = vadd.f32 %v2210_v51, %v1198_v50 }
 0x156   :  { %v2212_v44 = vpop.f32.mrf.mxu1  ;;  %v1287_v45 = vpack.c.bf16 %v1284_v42, %v1284_v42 }
 0x158   :  { %1622 = vmatprep.mubr.bf16.mxu1 %v1287_v45  ;;  %v2161_v45 = vld [vmem:[%s2940_s5 + $0x3] ss:$0 sm:$0xff] }
 0x159   :  { %1623 = vmatmul.mubr.bf16.vlgmr.msra.gmra.mxu1 %v1286_v46 }
 0x15a   :  { %2246 = vmatpush3.bf16.msra.mxu1 %v2554_v11  ;;  %2261 = vmatprep.mubr.msk.bf16.mxu1 %vm2611_vm1, %v2610_v12 }
 0x15b   :  { %2247 = vmatprep.subr.bf16.mxu1 %v2610_v12 }
 0x15e   :  { %2248 = vmatpush3.bf16.msra.mxu1 %v2555_v13 }
 0x15f   :  { %2249 = vmatprep.subr.bf16.mxu1 %v2610_v12 }
 0x16f   :  { %v2230_v53 = vpop.f32.mrf.mxu0 }
 0x171   :  { %v2231_v54 = vpop.f32.mrf.mxu0 }
 0x172   :  { %v2232_v56 = vadd.f32 %v2231_v54, %v2230_v53 }
 0x173   :  { %v2233_v57 = vpop.f32.mrf.mxu0 }
 0x174   :  { %v1278_v58 = vadd.f32 %v2232_v56, %v1238_v55 }
 0x175   :  { %v2234_v59 = vpop.f32.mrf.mxu0 }
 0x176   :  { %v1285_v60 = vmax.f32 %v1278_v58, 0.0 }
 0x178   :  { %v1288_v61 = vpack.c.bf16 %v1285_v60, %v1285_v60 }
 0x17a   :  { %1664 = vmatmul.mubr.bf16.vlgmr.msra.gmra.mxu0 %v1288_v61 }
 0x17b   :  { %1782 = vmatpush1.bf16.msra.mxu0 %v2542_v52 }
 0x17c   :  { %1783 = vmatprep.subr.bf16.mxu0 %v2609_v10 }
 0x17f   :  { %1784 = vmatpush1.bf16.msra.mxu0 %v2543_v62 }
 0x180   :  { %1785 = vmatprep.subr.bf16.mxu0 %v2609_v10 }
 0x183   :  { %1786 = vmatpush1.bf16.msra.mxu0 %v2544_v63 }
 0x184   :  { %1787 = vmatprep.subr.bf16.mxu0 %v2609_v10 }
 0x187   :  { %1788 = vmatpush1.bf16.msra.mxu0 %v2545_v0 }
 0x188   :  { %1789 = vmatprep.subr.bf16.mxu0 %v2609_v10 }
 0x18b   :  { %1790 = vmatpush1.bf16.msra.mxu0 %v2546_v1 }
 0x18c   :  { %1791 = vmatprep.subr.bf16.mxu0 %v2609_v10 }
 0x18f   :  { %1792 = vmatpush1.bf16.msra.mxu0 %v2547_v2 }
 0x190   :  { %1793 = vmatprep.subr.bf16.mxu0 %v2609_v10 }
 0x193   :  { %1794 = vmatpush1.bf16.msra.mxu0 %v2548_v3 }
 0x194   :  { %1795 = vmatprep.subr.bf16.mxu0 %v2609_v10 }
 0x197   :  { %1796 = vmatpush1.bf16.msra.mxu0 %v2549_v4 }
 0x198   :  { %1805 = vmatprep.subr.bf16.mxu0 %v2609_v10 }
 0x19b   :  { %1806 = vmatpush2.bf16.msra.mxu0 %v2550_v5 }
 0x19c   :  { %1807 = vmatprep.subr.bf16.mxu0 %v2609_v10 }
 0x19f   :  { %1808 = vmatpush2.bf16.msra.mxu0 %v2551_v6 }
 0x1a0   :  { %1809 = vmatprep.subr.bf16.mxu0 %v2609_v10 }
 0x1a3   :  { %1810 = vmatpush2.bf16.msra.mxu0 %v2552_v8 }
 0x1a4   :  { %1811 = vmatprep.subr.bf16.mxu0 %v2609_v10  ;;  %v2556_v10 = vld [vmem:[%s2939_s4 + $0x28] sm:$0xff]   ;;  %s2612_s4 = smov [#allocation5]  }
 0x1a5   :  { %2250 = vmatpush3.bf16.msra.mxu1 %v2556_v10  ;;  %s1939_s19 = sshll.u32 %s2612_s4, 4  ;;  %s1940_s19 = int_to_ptr.vmem [resolvable:$true] %s1939_s19 }
 0x1a6   :  { %2251 = vmatprep.subr.bf16.mxu1 %v2610_v12  ;;  %s2582_s20 = scalar_lea.vmem %s1940_s19, 128  ;;  %p2587_p6 = scmp.lt.s32.totalorder %s1940_s19, %s1940_s19 }
 0x1a7   :  { %1812 = vmatpush2.bf16.msra.mxu0 %v2553_v9  ;;  %p2583_p5 = scmp.ne.s32.totalorder %s1940_s19, %s2582_s20  ;;  %p2588_p7 = scmp.lt.s32.totalorder %s2582_s20, %s2582_s20 }
 0x1a9   :  { %2252 = vmatpush3.bf16.msra.mxu1 %v2557_v14  ;;  %p2589_p8 = por %p2588_p7, %p2587_p6 }
 0x1aa   :  { %2253 = vmatprep.subr.bf16.mxu1 %v2610_v12 }
 0x1ab   :  { %p2590_p9 = pnand %p2589_p8, %p2583_p5 }
 0x1ad   :  { %2254 = vmatpush3.bf16.msra.mxu1 %v2558_v15 }
 0x1ae   :  { %2255 = vmatprep.subr.bf16.mxu1 %v2610_v12 }
 0x1b1   :  { %2256 = vmatpush3.bf16.msra.mxu1 %v2559_v16 }
 0x1b2   :  { %2257 = vmatprep.subr.bf16.mxu1 %v2610_v12 }
 0x1b5   :  { %2258 = vmatpush3.bf16.msra.mxu1 %v2560_v23 }
 0x1b6   :  { %2259 = vmatprep.subr.bf16.mxu1 %v2610_v12 }
 0x1b9   :  { %2260 = vmatpush3.bf16.msra.mxu1 %v2561_v24 }
 0x219   :  { %v1624_v17 = vpop.f32.mrf.mxu1 }
 0x21a   :  { %v1625_v25 = vadd.f32 %v1624_v17, %v1343_v21 }
 0x21b   :  { %v1626_v18 = vpop.f32.mrf.mxu1 }
 0x21c   :  { %v1627_v28 = vadd.f32 %v1626_v18, %v1347_v22 }
 0x21d   :  { %v1628_v7 = vpop.f32.mrf.mxu1 }
 0x21f   :  { %v1629_v19 = vpop.f32.mrf.mxu1 }
 0x23a   :  { %v1665_v27 = vpop.f32.mrf.mxu0 }
 0x23b   :  { %v1666_v29 = vadd.f32 %v1665_v27, %v1625_v25 }
 0x23c   :  { %v1667_v30 = vpop.f32.mrf.mxu0 }
 0x23d   :  { %v1668_v31 = vadd.f32 %v1667_v30, %v1627_v28  ;;  %v1672_v32 = vmax.f32 %v1666_v29, 0.0 }
 0x23e   :  { %v1669_v33 = vpop.f32.mrf.mxu0 }
 0x23f   :  { %v1673_v34 = vmax.f32 %v1668_v31, 0.0  ;;  %v1674_v37 = vpack.c.bf16 %v1672_v32, %v1672_v32 }
 0x240   :  { %v1670_v35 = vpop.f32.mrf.mxu0 }
 0x241   :  { %v1675_v36 = vpack.c.bf16 %v1673_v34, %v1673_v34 }
 0x243   :  { %2160 = vmatprep.mubr.msk.bf16.mxu0 %vm1777_vm0, %v1675_v36 }
 0x244   :  { %1814 = vmatmul.mubr.bf16.vlgmr.msra.gmra.mxu0 %v1674_v37 }
 0x304   :  { %v1815_v38 = vpop.f32.mrf.mxu0 }
 0x305   :  { %v1816_v39 = vadd.f32 %v2147_v26, %v1815_v38 }
 0x306   :  { %v1817_v40 = vpop.f32.mrf.mxu0 }
 0x307   :  { %v1821_v41 = vmax.f32 %v1816_v39, 0.0 }
 0x308   :  { %v1818_v42 = vpop.f32.mrf.mxu0 }
 0x309   :  { %v1822_v43 = vpack.c.bf16 %v1821_v41, %v1821_v41 }
 0x30a   :  { %v1819_v44 = vpop.f32.mrf.mxu0 }
 0x30b   :  { %2262 = vmatmul.mubr.bf16.vlgmr.msra.gmra.mxu1 %v1822_v43 }
 0x3cb   :  { %v1926_v46 = vpop.f32.mrf.mxu1 }
 0x3cc   :  { %v1927_v47 = vadd.f32 %v2161_v45, %v1926_v46 }
 0x3cd   :  { %v2263_v48 = vpop.f32.mrf.mxu1 }
 0x3ce   :  { %1932 = vst [vmem:[#allocation5] sm:$0xff] %v1927_v47 }
 0x3cf   :  { %v1929_v49 = vpop.f32.mrf.mxu1 }
 0x3d0   :  { %2593 = shalt.err (!%p2590_p9)
}
 0x3d1   :  { %1942 = dma.vmem_to_hbm [thread:$0]  %s1940_s19, 128, %s2941_s6, [#allocation4]   ;;  %v2264_v50 = vpop.f32.mrf.mxu1 }
 0x3d2   :  { %2604 = dma.done.wait [#allocation4], 128  }
 0x3d3   :  { %2605 = vsyncadd [#allocation4], 4294967168 }
 0x3d4   :  { %1946 = vsyncpa [#allocation3], 1 }
 0x3d5   :  { %1947 = vsyncpa [#allocation4], 1 }

</bundles_post_ra>
